<compile_context>
chip_gen: v5e
topology: v5e:2x2
jax: 0.10.0
libtpu: 0.0.40
codegen_flags: <defaults>
</compile_context>

<pallas_src>
import jax
import jax.numpy as jnp
from jax.experimental import pallas as pl
from jax.experimental.pallas import tpu as pltpu


def mlp_kernel(uidx_ref, iidx_ref, ut_ref, it_ref, w1u_ref, w1v_ref, b1_ref,
               w2_ref, b2_ref, wf_ref, bf_ref, o_ref):
    # Batch-on-lanes layout: every activation is (features, tb).
    uid = uidx_ref[...]                                  # (1, tb) int32
    iid = iidx_ref[...]                                  # (1, tb) int32
    n_users = ut_ref.shape[1]
    n_items = it_ref.shape[1]
    tb = uid.shape[1]

    # Fused embedding gather: one-hot matmul against the VMEM-resident tables.
    oh_u = (jax.lax.broadcasted_iota(jnp.int32, (n_users, tb), 0)
            == uid).astype(jnp.float32)                  # (Nu, tb)
    oh_v = (jax.lax.broadcasted_iota(jnp.int32, (n_items, tb), 0)
            == iid).astype(jnp.float32)                  # (Ni, tb)
    u = jnp.dot(ut_ref[...], oh_u,
                preferred_element_type=jnp.float32)      # (E, tb)
    v = jnp.dot(it_ref[...], oh_v,
                preferred_element_type=jnp.float32)      # (E, tb)

    # fc layer 1 : relu(W1_u^T u + W1_v^T v + b1)         (concat eliminated)
    h1 = (jnp.dot(w1u_ref[...], u, preferred_element_type=jnp.float32)
          + jnp.dot(w1v_ref[...], v, preferred_element_type=jnp.float32)
          + b1_ref[...])                                 # (H1, tb)
    h1 = jnp.maximum(h1, 0.0)

    # fc layer 2 : relu(W2^T h1 + b2)
    h2 = jnp.dot(w2_ref[...], h1,
                 preferred_element_type=jnp.float32) + b2_ref[...]   # (H2, tb)
    h2 = jnp.maximum(h2, 0.0)

    # final linear (-> 1) + sigmoid; output stays lane-dense as (1, tb)
    logit = jnp.dot(wf_ref[...], h2,
                    preferred_element_type=jnp.float32) + bf_ref[0, 0]
    o_ref[...] = jax.nn.sigmoid(logit)                   # (1, tb)


def mlp_forward(user_input, item_input, params, *, tb=8192):
    """user_input/item_input: int32 (B,). Returns (B, 1) float32 scores."""
    user_table, item_table, w1, b1, w2, b2, wf, bf = params
    E = user_table.shape[1]
    Nu = user_table.shape[0]
    Ni = item_table.shape[0]
    H1 = w1.shape[1]
    H2 = w2.shape[1]

    B = user_input.shape[0]
    # Clamp the tile so tiny batches don't compute thousands of padded rows,
    # but keep it a multiple of 128 (lane width).
    tb = min(tb, ((B + 127) // 128) * 128)
    nb = pl.cdiv(B, tb)
    B_pad = nb * tb
    if B_pad != B:
        pad = B_pad - B
        user_input = jnp.concatenate(
            [user_input, jnp.zeros((pad,), user_input.dtype)])
        item_input = jnp.concatenate(
            [item_input, jnp.zeros((pad,), item_input.dtype)])

    # Only the int32 ids stream through HBM per batch element.
    uidx = user_input.astype(jnp.int32).reshape(1, B_pad)
    iidx = item_input.astype(jnp.int32).reshape(1, B_pad)

    # Tables / weights in transposed (out, in) orientation; W1 split by half.
    ut = user_table.T                   # (E, Nu)   VMEM-resident
    it = item_table.T                   # (E, Ni)   VMEM-resident
    w1u_t = w1[:E].T                    # (H1, E)
    w1v_t = w1[E:].T                    # (H1, E)
    b1_c = b1.reshape(H1, 1)            # (H1, 1)
    w2_t = w2.T                         # (H2, H1)
    b2_c = b2.reshape(H2, 1)            # (H2, 1)
    wf_t = wf.T                         # (1, H2)
    bf_s = bf.reshape(1, 1)             # (1, 1) scalar bias -> SMEM

    out = pl.pallas_call(
        mlp_kernel,
        out_shape=jax.ShapeDtypeStruct((1, B_pad), jnp.float32),
        grid_spec=pltpu.PrefetchScalarGridSpec(
            num_scalar_prefetch=0,
            grid=(nb,),
            in_specs=[
                pl.BlockSpec((1, tb), lambda b: (0, b)),      # user ids tile
                pl.BlockSpec((1, tb), lambda b: (0, b)),      # item ids tile
                pl.BlockSpec((E, Nu), lambda b: (0, 0)),      # user table^T
                pl.BlockSpec((E, Ni), lambda b: (0, 0)),      # item table^T
                pl.BlockSpec((H1, E), lambda b: (0, 0)),      # W1_u^T (full)
                pl.BlockSpec((H1, E), lambda b: (0, 0)),      # W1_v^T (full)
                pl.BlockSpec((H1, 1), lambda b: (0, 0)),      # b1 column
                pl.BlockSpec((H2, H1), lambda b: (0, 0)),     # W2^T (full)
                pl.BlockSpec((H2, 1), lambda b: (0, 0)),      # b2 column
                pl.BlockSpec((1, H2), lambda b: (0, 0)),      # W_final^T
                pl.BlockSpec(memory_space=pltpu.MemorySpace.SMEM),  # b_final
            ],
            out_specs=pl.BlockSpec((1, tb), lambda b: (0, b)),
        ),
        compiler_params=pltpu.CompilerParams(
            dimension_semantics=("parallel",)),
    )(uidx, iidx, ut, it, w1u_t, w1v_t, b1_c, w2_t, b2_c, wf_t, bf_s)

    # lane-dense (1, B_pad) row back to the module's (B, 1) shape.
    return out.reshape(-1)[:B].reshape(B, 1)


def init_params(key, n_users, n_items, embedding_dim, layers):
    """layers = [2*embedding_dim, h1, h2]; deterministic synthetic init."""
    ks = jax.random.split(key, 8)
    user_table = jax.random.normal(ks[0], (n_users, embedding_dim), jnp.float32) * 0.1
    item_table = jax.random.normal(ks[1], (n_items, embedding_dim), jnp.float32) * 0.1
    w1 = jax.random.normal(ks[2], (layers[0], layers[1]), jnp.float32) * 0.1
    b1 = jax.random.normal(ks[3], (1, layers[1]), jnp.float32) * 0.1
    w2 = jax.random.normal(ks[4], (layers[1], layers[2]), jnp.float32) * 0.1
    b2 = jax.random.normal(ks[5], (1, layers[2]), jnp.float32) * 0.1
    wf = jax.random.normal(ks[6], (layers[2], 1), jnp.float32) * 0.1
    bf = jax.random.normal(ks[7], (1, 1), jnp.float32) * 0.1
    return (user_table, item_table, w1, b1, w2, b2, wf, bf)


def reference_forward(user_input, item_input, params):
    """Pure-JAX reference mirroring the PyTorch forward (ncf=False)."""
    user_table, item_table, w1, b1, w2, b2, wf, bf = params
    u = jnp.take(user_table, user_input, axis=0)
    v = jnp.take(item_table, item_input, axis=0)
    x = jnp.concatenate([u, v], axis=-1)
    x = jnp.maximum(jnp.maximum(x @ w1 + b1, 0.0), 0.0)
    x = jnp.maximum(jnp.maximum(x @ w2 + b2, 0.0), 0.0)
    return jax.nn.sigmoid(x @ wf + bf)


if __name__ == "__main__":
    key = jax.random.PRNGKey(0)
    n_users, n_items = 32, 64
    embedding_dim = 16
    layers = [2 * embedding_dim, 16, 8]   # MLP layer sizes (first = 2*E)
    B = 8

    kp, ku, ki = jax.random.split(key, 3)
    params = init_params(kp, n_users, n_items, embedding_dim, layers)
    user_input = jax.random.randint(ku, (B,), 0, n_users, dtype=jnp.int32)
    item_input = jax.random.randint(ki, (B,), 0, n_items, dtype=jnp.int32)

    out = mlp_forward(user_input, item_input, params)
    out = jax.block_until_ready(out)

    ref = reference_forward(user_input, item_input, params)
    assert out.shape == (B, 1)
    assert jnp.allclose(out, ref, atol=1e-4, rtol=1e-3), \
        float(jnp.max(jnp.abs(out - ref)))

    print("KERNEL_OK")
</pallas_src>

<mosaic_0001>
module attributes {stable_mosaic.version = 11 : i64} {
  func.func @mlp_kernel(%arg0: i32, %arg1: memref<1x128xi32, #tpu.memory_space<vmem>>, %arg2: memref<1x128xi32, #tpu.memory_space<vmem>>, %arg3: memref<16x32xf32, #tpu.memory_space<vmem>>, %arg4: memref<16x64xf32, #tpu.memory_space<vmem>>, %arg5: memref<16x16xf32, #tpu.memory_space<vmem>>, %arg6: memref<16x16xf32, #tpu.memory_space<vmem>>, %arg7: memref<16x1xf32, #tpu.memory_space<vmem>>, %arg8: memref<8x16xf32, #tpu.memory_space<vmem>>, %arg9: memref<8x1xf32, #tpu.memory_space<vmem>>, %arg10: memref<1x8xf32, #tpu.memory_space<vmem>>, %arg11: memref<1x1xf32, #tpu.memory_space<smem>>, %arg12: memref<1x128xf32, #tpu.memory_space<vmem>>) attributes {dimension_semantics = [#tpu.dimension_semantics<parallel>], iteration_bounds = array<i64: 1>, scalar_prefetch = 0 : i64, scratch_operands = 0 : i64, tpu.core_type = #tpu.core_type<tc>, window_params = [{transform_indices = @transform_0, window_bounds = array<i64: 1, 128>}, {transform_indices = @transform_1, window_bounds = array<i64: 1, 128>}, {pipeline_mode = #tpu.pipeline_mode<synchronous>, transform_indices = @transform_2, window_bounds = array<i64: 16, 32>}, {pipeline_mode = #tpu.pipeline_mode<synchronous>, transform_indices = @transform_3, window_bounds = array<i64: 16, 64>}, {pipeline_mode = #tpu.pipeline_mode<synchronous>, transform_indices = @transform_4, window_bounds = array<i64: 16, 16>}, {pipeline_mode = #tpu.pipeline_mode<synchronous>, transform_indices = @transform_5, window_bounds = array<i64: 16, 16>}, {pipeline_mode = #tpu.pipeline_mode<synchronous>, transform_indices = @transform_6, window_bounds = array<i64: 16, 1>}, {pipeline_mode = #tpu.pipeline_mode<synchronous>, transform_indices = @transform_7, window_bounds = array<i64: 8, 16>}, {pipeline_mode = #tpu.pipeline_mode<synchronous>, transform_indices = @transform_8, window_bounds = array<i64: 8, 1>}, {pipeline_mode = #tpu.pipeline_mode<synchronous>, transform_indices = @transform_9, window_bounds = array<i64: 1, 8>}, {transform_indices = @transform_10, window_bounds = array<i64: 1, 1>}, {transform_indices = @transform_11, window_bounds = array<i64: 1, 128>}]} {
    %c0 = arith.constant 0 : index
    %c0_0 = arith.constant 0 : index
    %0 = vector.load %arg1[%c0, %c0_0] : memref<1x128xi32, #tpu.memory_space<vmem>>, vector<1x128xi32>
    %c0_1 = arith.constant 0 : index
    %c0_2 = arith.constant 0 : index
    %1 = vector.load %arg2[%c0_1, %c0_2] : memref<1x128xi32, #tpu.memory_space<vmem>>, vector<1x128xi32>
    %2 = tpu.iota {dimensions = array<i32: 0>} : vector<32x128xi32>
    %3 = vector.broadcast %0 : vector<1x128xi32> to vector<32x128xi32>
    %4 = arith.cmpi eq, %2, %3 : vector<32x128xi32>
    %5 = arith.extui %4 : vector<32x128xi1> to vector<32x128xi32>
    %6 = arith.sitofp %5 : vector<32x128xi32> to vector<32x128xf32>
    %7 = tpu.iota {dimensions = array<i32: 0>} : vector<64x128xi32>
    %8 = vector.broadcast %1 : vector<1x128xi32> to vector<64x128xi32>
    %9 = arith.cmpi eq, %7, %8 : vector<64x128xi32>
    %10 = arith.extui %9 : vector<64x128xi1> to vector<64x128xi32>
    %11 = arith.sitofp %10 : vector<64x128xi32> to vector<64x128xf32>
    %c0_3 = arith.constant 0 : index
    %c0_4 = arith.constant 0 : index
    %12 = vector.load %arg3[%c0_3, %c0_4] : memref<16x32xf32, #tpu.memory_space<vmem>>, vector<16x32xf32>
    %cst = arith.constant dense<0.000000e+00> : vector<16x128xf32>
    %13 = tpu.matmul %12, %6, %cst {dimension_numbers = #tpu.dot_dimension_numbers<[1], [0], [0], [1], [0, 0, 1, 1], [], []>} : vector<16x32xf32>, vector<32x128xf32>, vector<16x128xf32> -> vector<16x128xf32>
    %c0_5 = arith.constant 0 : index
    %c0_6 = arith.constant 0 : index
    %14 = vector.load %arg4[%c0_5, %c0_6] : memref<16x64xf32, #tpu.memory_space<vmem>>, vector<16x64xf32>
    %cst_7 = arith.constant dense<0.000000e+00> : vector<16x128xf32>
    %15 = tpu.matmul %14, %11, %cst_7 {dimension_numbers = #tpu.dot_dimension_numbers<[1], [0], [0], [1], [0, 0, 1, 1], [], []>} : vector<16x64xf32>, vector<64x128xf32>, vector<16x128xf32> -> vector<16x128xf32>
    %c0_8 = arith.constant 0 : index
    %c0_9 = arith.constant 0 : index
    %16 = vector.load %arg5[%c0_8, %c0_9] : memref<16x16xf32, #tpu.memory_space<vmem>>, vector<16x16xf32>
    %cst_10 = arith.constant dense<0.000000e+00> : vector<16x128xf32>
    %17 = tpu.matmul %16, %13, %cst_10 {dimension_numbers = #tpu.dot_dimension_numbers<[1], [0], [0], [1], [0, 0, 1, 1], [], []>} : vector<16x16xf32>, vector<16x128xf32>, vector<16x128xf32> -> vector<16x128xf32>
    %c0_11 = arith.constant 0 : index
    %c0_12 = arith.constant 0 : index
    %18 = vector.load %arg6[%c0_11, %c0_12] : memref<16x16xf32, #tpu.memory_space<vmem>>, vector<16x16xf32>
    %cst_13 = arith.constant dense<0.000000e+00> : vector<16x128xf32>
    %19 = tpu.matmul %18, %15, %cst_13 {dimension_numbers = #tpu.dot_dimension_numbers<[1], [0], [0], [1], [0, 0, 1, 1], [], []>} : vector<16x16xf32>, vector<16x128xf32>, vector<16x128xf32> -> vector<16x128xf32>
    %20 = arith.addf %17, %19 : vector<16x128xf32>
    %c0_14 = arith.constant 0 : index
    %c0_15 = arith.constant 0 : index
    %21 = vector.load %arg7[%c0_14, %c0_15] : memref<16x1xf32, #tpu.memory_space<vmem>>, vector<16x1xf32>
    %22 = vector.broadcast %21 : vector<16x1xf32> to vector<16x128xf32>
    %23 = arith.addf %20, %22 : vector<16x128xf32>
    %cst_16 = arith.constant 0.000000e+00 : f32
    %24 = vector.broadcast %cst_16 : f32 to vector<16x128xf32>
    %25 = arith.maximumf %23, %24 : vector<16x128xf32>
    %c0_17 = arith.constant 0 : index
    %c0_18 = arith.constant 0 : index
    %26 = vector.load %arg8[%c0_17, %c0_18] : memref<8x16xf32, #tpu.memory_space<vmem>>, vector<8x16xf32>
    %cst_19 = arith.constant dense<0.000000e+00> : vector<8x128xf32>
    %27 = tpu.matmul %26, %25, %cst_19 {dimension_numbers = #tpu.dot_dimension_numbers<[1], [0], [0], [1], [0, 0, 1, 1], [], []>} : vector<8x16xf32>, vector<16x128xf32>, vector<8x128xf32> -> vector<8x128xf32>
    %c0_20 = arith.constant 0 : index
    %c0_21 = arith.constant 0 : index
    %28 = vector.load %arg9[%c0_20, %c0_21] : memref<8x1xf32, #tpu.memory_space<vmem>>, vector<8x1xf32>
    %29 = vector.broadcast %28 : vector<8x1xf32> to vector<8x128xf32>
    %30 = arith.addf %27, %29 : vector<8x128xf32>
    %cst_22 = arith.constant 0.000000e+00 : f32
    %31 = vector.broadcast %cst_22 : f32 to vector<8x128xf32>
    %32 = arith.maximumf %30, %31 : vector<8x128xf32>
    %c0_23 = arith.constant 0 : index
    %c0_24 = arith.constant 0 : index
    %33 = vector.load %arg10[%c0_23, %c0_24] : memref<1x8xf32, #tpu.memory_space<vmem>>, vector<1x8xf32>
    %cst_25 = arith.constant dense<0.000000e+00> : vector<1x128xf32>
    %34 = tpu.matmul %33, %32, %cst_25 {dimension_numbers = #tpu.dot_dimension_numbers<[1], [0], [0], [1], [0, 0, 1, 1], [], []>} : vector<1x8xf32>, vector<8x128xf32>, vector<1x128xf32> -> vector<1x128xf32>
    %c0_26 = arith.constant 0 : index
    %c0_27 = arith.constant 0 : index
    %35 = memref.load %arg11[%c0_26, %c0_27] : memref<1x1xf32, #tpu.memory_space<smem>>
    %36 = vector.broadcast %35 : f32 to vector<1x128xf32>
    %37 = arith.addf %34, %36 : vector<1x128xf32>
    %38 = arith.negf %37 : vector<1x128xf32>
    %39 = math.exp %38 : vector<1x128xf32>
    %cst_28 = arith.constant 1.000000e+00 : f32
    %40 = vector.broadcast %cst_28 : f32 to vector<1x128xf32>
    %41 = arith.addf %40, %39 : vector<1x128xf32>
    %42 = arith.divf %40, %41 : vector<1x128xf32>
    %c0_29 = arith.constant 0 : index
    %c0_30 = arith.constant 0 : index
    %43 = vector.load %arg12[%c0_29, %c0_30] : memref<1x128xf32, #tpu.memory_space<vmem>>, vector<1x128xf32>
    tpu.vector_store %arg12[%c0_29, %c0_30], %42 {strides = array<i32>} : memref<1x128xf32, #tpu.memory_space<vmem>>, vector<1x128xf32>,
    return
  }
  func.func @transform_0(%arg0: i32) -> (i32, i32) {
    %c0_i32 = arith.constant 0 : i32
    %c0_i32_0 = arith.constant 0 : i32
    return %c0_i32, %arg0 : i32, i32
  }
  func.func @transform_1(%arg0: i32) -> (i32, i32) {
    %c0_i32 = arith.constant 0 : i32
    %c0_i32_0 = arith.constant 0 : i32
    return %c0_i32, %arg0 : i32, i32
  }
  func.func @transform_2(%arg0: i32) -> (i32, i32) {
    %c0_i32 = arith.constant 0 : i32
    %c0_i32_0 = arith.constant 0 : i32
    %c0_i32_1 = arith.constant 0 : i32
    return %c0_i32, %c0_i32_0 : i32, i32
  }
  func.func @transform_3(%arg0: i32) -> (i32, i32) {
    %c0_i32 = arith.constant 0 : i32
    %c0_i32_0 = arith.constant 0 : i32
    %c0_i32_1 = arith.constant 0 : i32
    return %c0_i32, %c0_i32_0 : i32, i32
  }
  func.func @transform_4(%arg0: i32) -> (i32, i32) {
    %c0_i32 = arith.constant 0 : i32
    %c0_i32_0 = arith.constant 0 : i32
    %c0_i32_1 = arith.constant 0 : i32
    return %c0_i32, %c0_i32_0 : i32, i32
  }
  func.func @transform_5(%arg0: i32) -> (i32, i32) {
    %c0_i32 = arith.constant 0 : i32
    %c0_i32_0 = arith.constant 0 : i32
    %c0_i32_1 = arith.constant 0 : i32
    return %c0_i32, %c0_i32_0 : i32, i32
  }
  func.func @transform_6(%arg0: i32) -> (i32, i32) {
    %c0_i32 = arith.constant 0 : i32
    %c0_i32_0 = arith.constant 0 : i32
    %c0_i32_1 = arith.constant 0 : i32
    return %c0_i32, %c0_i32_0 : i32, i32
  }
  func.func @transform_7(%arg0: i32) -> (i32, i32) {
    %c0_i32 = arith.constant 0 : i32
    %c0_i32_0 = arith.constant 0 : i32
    %c0_i32_1 = arith.constant 0 : i32
    return %c0_i32, %c0_i32_0 : i32, i32
  }
  func.func @transform_8(%arg0: i32) -> (i32, i32) {
    %c0_i32 = arith.constant 0 : i32
    %c0_i32_0 = arith.constant 0 : i32
    %c0_i32_1 = arith.constant 0 : i32
    return %c0_i32, %c0_i32_0 : i32, i32
  }
  func.func @transform_9(%arg0: i32) -> (i32, i32) {
    %c0_i32 = arith.constant 0 : i32
    %c0_i32_0 = arith.constant 0 : i32
    %c0_i32_1 = arith.constant 0 : i32
    return %c0_i32, %c0_i32_0 : i32, i32
  }
  func.func @transform_10(%arg0: i32) -> (i32, i32) {
    %c0_i32 = arith.constant 0 : i32
    %c0_i32_0 = arith.constant 0 : i32
    %c0_i32_1 = arith.constant 0 : i32
    return %c0_i32, %c0_i32_0 : i32, i32
  }
  func.func @transform_11(%arg0: i32) -> (i32, i32) {
    %c0_i32 = arith.constant 0 : i32
    %c0_i32_0 = arith.constant 0 : i32
    return %c0_i32, %arg0 : i32, i32
  }
}

</mosaic_0001>

<bundles_post_ra>
// kernel: tpu_custom_call.1
= control target key start
LH: loop header
LB: loop body
LE: loop exit
PB: predicated region body
PF: predicated region fallthrough
CT: control target
= control target key end

     0   :  { %17 = vsyncpa [#allocation4], 0  ;;  %s645_s0 = inlined_call_operand.vmem [shape: s32[1,128], index: 0, kind: input, shape index: {}]   ;;  %s646_s1 = inlined_call_operand.vmem [shape: s32[1,128], index: 1, kind: input, shape index: {}]   ;;  %s647_s2 = inlined_call_operand.vmem [shape: f32[16,32], index: 2, kind: input, shape index: {}]   ;;  %s648_s3 = inlined_call_operand.hbm [shape: f32[16,64], index: 3, kind: input, shape index: {}]   ;;  %s649_s4 = inlined_call_operand.hbm [shape: f32[16,16], index: 4, kind: input, shape index: {}]   ;;  %s650_s5 = inlined_call_operand.hbm [shape: f32[16,16], index: 5, kind: input, shape index: {}]   ;;  %s651_s6 = inlined_call_operand.vmem [shape: f32[16,1], index: 6, kind: input, shape index: {}]   ;;  %s652_s7 = inlined_call_operand.vmem [shape: f32[8,16], index: 7, kind: input, shape index: {}]   ;;  %s653_s8 = inlined_call_operand.vmem [shape: f32[8,1], index: 8, kind: input, shape index: {}]   ;;  %s654_s9 = inlined_call_operand.vmem [shape: f32[1,8], index: 9, kind: input, shape index: {}]   ;;  %s655_s10 = inlined_call_operand.<no memory space> [shape: f32[1,1], index: 10, kind: input, shape index: {}]   ;;  %s656_s11 = inlined_call_operand.hbm [shape: f32[1,128], index: 11, kind: output, shape index: {}]  }
   0x1   :  { %18 = vsyncpa [#allocation7], 0 }
   0x2   :  { %19 = vsyncpa [#allocation5], 0  ;;  %s43_s19 = sshll.u32 %s649_s4, 4  ;;  %s528_s20 = smov [#allocation6]   ;;  %s44_s19 = int_to_ptr.hbm [resolvable:$true] %s43_s19 }
   0x3   :  { %s45_s21 = sshll.u32 %s528_s20, 4  ;;  %s30_s24 = sshll.u32 %s648_s3, 4  ;;  %s46_s21 = int_to_ptr.vmem [resolvable:$true] %s45_s21  ;;  %s31_s24 = int_to_ptr.hbm [resolvable:$true] %s30_s24 }
   0x4   :  { %s529_s25 = smov 128   ;;  %s530_s26 = smov 8  }
   0x5   :  { %51 = dma.hbm_to_vmem [thread:$0]  %s44_s19, 256, %s46_s21, [#allocation7], %s529_s25, %s529_s25, %s530_s26  }
   0x6   :  { %s531_s27 = smov [#allocation3]   ;;  %s56_s12 = sshll.u32 %s650_s5, 4  ;;  %s57_s12 = int_to_ptr.hbm [resolvable:$true] %s56_s12 }
   0x7   :  { %s32_s28 = sshll.u32 %s531_s27, 4  ;;  %s532_s4 = smov [#allocation8]   ;;  %s33_s28 = int_to_ptr.vmem [resolvable:$true] %s32_s28 }
   0x8   :  { %38 = dma.hbm_to_vmem [thread:$0]  %s31_s24, 256, %s33_s28, [#allocation4], %s529_s25, %s529_s25, %s530_s26  }
   0x9   :  { %s58_s13 = sshll.u32 %s532_s4, 4  ;;  %s59_s13 = int_to_ptr.vmem [resolvable:$true] %s58_s13 }
   0xa   :  { %64 = dma.hbm_to_vmem [thread:$0]  %s57_s12, 256, %s59_s13, [#allocation7], %s529_s25, %s529_s25, %s530_s26  }
   0xb   :  { %522 = dma.done.wait [#allocation4], 256  }
   0xc   :  { %523 = vsyncadd [#allocation4], 4294967040 }
   0xd   :  { %524 = dma.done.wait [#allocation7], 512  }
   0xe   :  { %525 = vsyncadd [#allocation7], 4294966784  ;;  %v89_v0 = vlaneseq  ;;  %v420_v7 = vld [vmem:[%s645_s0] ss:$0 sm:$0xff]  ;;  %v533_v10 = vmov 1.0   ;;  %vm138_vm8 = vcmask 261120   ;;  %v312_v46 = vstv %s655_s10 }
   0xf   :  { %v421_v8 = vld [vmem:[%s646_s1] ss:$0 sm:$0xff]  ;;  %v137_v13 = vld [vmem:[%s647_s2 + $0x8] sm:$0xff]  ;;  %vm170_vm13 = vcmask 523264   ;;  %v534_v17 = vmov 0   ;;  %vm204_vm14 = vcmask 130048  }
  0x10   :  { %v90_v1 = vshrl.u32 %v89_v0, 7  ;;  %v136_v12 = vld [vmem:[%s647_s2] sm:$0xff]  ;;  %v169_v15 = vld [vmem:[#allocation3 + $0x8] sm:$0xff]  ;;  %418 = vset.pattern.permute.xlu0 %v534_v17  ;;  %419 = vset.pattern.permute.xlu1 %v534_v17  ;;  %v200_v22 = vld [vmem:[#allocation6] sm:$0xff]  ;;  %vm313_vm15 = vcmask 64512   ;;  %s364_s10 = sshll.u32 %s656_s11, 4  ;;  %s365_s10 = int_to_ptr.hbm [resolvable:$true] %s364_s10 }
  0x11   :  { %v168_v14 = vld [vmem:[#allocation3] sm:$0xff]  ;;  %v264_v16 = vld [vmem:[%s651_s6 + $0x8] sm:$0xff]  ;;  %v201_v24 = vld [vmem:[#allocation6 + $0x8] sm:$0xff] }
  0x12   :  { %v93_v2 = vadd.s32 24, %v90_v1  ;;  %v92_v3 = vadd.s32 16, %v90_v1  ;;  %v110_v4 = vadd.s32 56, %v90_v1  ;;  %v109_v5 = vadd.s32 48, %v90_v1  ;;  %272 = vperm.xlu0 %418, %v264_v16   ;;  %v263_v19 = vld [vmem:[%s651_s6] sm:$0xff]  ;;  %v203_v26 = vld [vmem:[#allocation8 + $0x8] sm:$0xff] }
  0x13   :  { %v91_v6 = vadd.s32 8, %v90_v1  ;;  %v108_v9 = vadd.s32 40, %v90_v1  ;;  %v107_v11 = vadd.s32 32, %v90_v1  ;;  %vm95_vm6 = vcmp.eq.s32.totalorder %v90_v1, %v420_v7  ;;  %v202_v25 = vld [vmem:[#allocation8] sm:$0xff] }
  0x14   :  { %vm98_vm0 = vcmp.eq.s32.totalorder %v93_v2, %v420_v7  ;;  %vm97_vm1 = vcmp.eq.s32.totalorder %v92_v3, %v420_v7  ;;  %vm119_vm2 = vcmp.eq.s32.totalorder %v110_v4, %v421_v8  ;;  %vm118_vm3 = vcmp.eq.s32.totalorder %v109_v5, %v421_v8  ;;  %v280_v27 = vld [vmem:[%s653_s8] sm:$0xff] }
  0x15   :  { %387 = vmatpush.msk.msra.mxu0 %vm98_vm0, %v533_v10  ;;  %393 = vmatpush.msk.msra.mxu1 %vm119_vm2, %v533_v10  ;;  %vm96_vm4 = vcmp.eq.s32.totalorder %v91_v6, %v420_v7  ;;  %vm117_vm5 = vcmp.eq.s32.totalorder %v108_v9, %v421_v8  ;;  %vm116_vm7 = vcmp.eq.s32.totalorder %v107_v11, %v421_v8  ;;  %v279_v40 = vld [vmem:[%s652_s7] sm:$0xff]  ;;  %s535_s7 = smov [#allocation9]  }
  0x16   :  { %vm115_vm9 = vcmp.eq.s32.totalorder %v93_v2, %v421_v8  ;;  %vm114_vm10 = vcmp.eq.s32.totalorder %v92_v3, %v421_v8  ;;  %vm113_vm11 = vcmp.eq.s32.totalorder %v91_v6, %v421_v8  ;;  %vm112_vm12 = vcmp.eq.s32.totalorder %v90_v1, %v421_v8  ;;  %283 = vperm.xlu1 %419, %v280_v27   ;;  %v310_v45 = vld [vmem:[%s654_s9] sm:$0x1]  ;;  %s362_s9 = sshll.u32 %s535_s7, 4  ;;  %s363_s9 = int_to_ptr.vmem [resolvable:$true] %s362_s9 }
  0x17   :  { %388 = vmatpush.msk.msra.mxu0 %vm97_vm1, %v533_v10  ;;  %394 = vmatpush.msk.msra.mxu1 %vm118_vm3, %v533_v10 }
  0x19   :  { %389 = vmatpush.msk.msra.mxu0 %vm96_vm4, %v533_v10  ;;  %395 = vmatpush.msk.msra.mxu1 %vm117_vm5, %v533_v10 }
  0x1a   :  { %267 = vperm.xlu0 %418, %v263_v19  }
  0x1b   :  { %390 = vmatpush.msk.msra.mxu0 %vm95_vm6, %v533_v10  ;;  %396 = vmatpush.msk.msra.mxu1 %vm116_vm7, %v533_v10 }
  0x1c   :  { %391 = vmatmul.msk.f32.vlgmr.msra.gmra.mxu0 %vm138_vm8, %v136_v12 }
  0x1d   :  { %397 = vmatpush.msk.msra.mxu1 %vm115_vm9, %v533_v10 }
  0x1f   :  { %398 = vmatpush.msk.msra.mxu1 %vm114_vm10, %v533_v10 }
  0x21   :  { %399 = vmatpush.msk.msra.mxu1 %vm113_vm11, %v533_v10 }
  0x23   :  { %400 = vmatpush.msk.msra.mxu1 %vm112_vm12, %v533_v10 }
  0x24   :  { %392 = vmatmul.msk.f32.gmra.mxu0 %vm138_vm8, %v137_v13  ;;  %401 = vmatmul.msk.f32.vlgmr.msra.gmra.mxu1 %vm170_vm13, %v168_v14 }
  0x2c   :  { %402 = vmatmul.msk.f32.gmra.mxu1 %vm170_vm13, %v169_v15 }
  0x84   :  { %v273_v29 = vpop.permute.xlu0 %272 }
  0x88   :  { %v284_v41 = vpop.permute.xlu1 %283 }
  0x8c   :  { %v268_v33 = vpop.permute.xlu0 %267 }
  0x99   :  { %v162_v18 = vpop.f32.mrf.mxu0 }
  0xa1   :  { %v165_v20 = vpop.f32.mrf.mxu0  ;;  %v194_v21 = vpop.f32.mrf.mxu1 }
  0xa2   :  { %254 = vmatpush.msra.mxu3 %v165_v20 }
  0xa4   :  { %255 = vmatpush.msra.mxu3 %v162_v18 }
  0xa5   :  { %405 = vmatmul.msk.f32.vlgmr.msra.gmra.mxu3 %vm204_vm14, %v200_v22 }
  0xa9   :  { %v197_v23 = vpop.f32.mrf.mxu1 }
  0xaa   :  { %225 = vmatpush.msra.mxu2 %v197_v23 }
  0xac   :  { %226 = vmatpush.msra.mxu2 %v194_v21 }
  0xad   :  { %406 = vmatmul.msk.f32.gmra.mxu3 %vm204_vm14, %v201_v24  ;;  %403 = vmatmul.msk.f32.vlgmr.msra.gmra.mxu2 %vm204_vm14, %v202_v25 }
  0xb5   :  { %404 = vmatmul.msk.f32.gmra.mxu2 %vm204_vm14, %v203_v26 }
 0x128   :  { %v257_v28 = vpop.f32.mrf.mxu3 }
 0x130   :  { %v228_v30 = vpop.f32.mrf.mxu2  ;;  %v260_v31 = vpop.f32.mrf.mxu3 }
 0x131   :  { %v258_v32 = vadd.f32 %v257_v28, %v228_v30 }
 0x133   :  { %v275_v36 = vadd.f32 %v268_v33, %v258_v32 }
 0x135   :  { %v277_v39 = vmax.f32 %v275_v36, 0.0 }
 0x138   :  { %v231_v34 = vpop.f32.mrf.mxu2 }
 0x139   :  { %v261_v35 = vadd.f32 %v260_v31, %v231_v34 }
 0x13b   :  { %v276_v37 = vadd.f32 %v273_v29, %v261_v35 }
 0x13d   :  { %v278_v38 = vmax.f32 %v276_v37, 0.0 }
 0x13f   :  { %303 = vmatpush.msrb.mxu2 %v278_v38 }
 0x141   :  { %304 = vmatpush.msrb.mxu2 %v277_v39 }
 0x142   :  { %407 = vmatmul.msk.f32.vlgmr.msrb.gmra.mxu2 %vm204_vm14, %v279_v40 }
 0x1c5   :  { %v306_v42 = vpop.f32.mrf.mxu2 }
 0x1c6   :  { %v307_v43 = vadd.f32 %v306_v42, %v284_v41 }
 0x1c8   :  { %v309_v44 = vmax.f32 %v307_v43, 0.0 }
 0x1ca   :  { %332 = vmatpush.msrb.mxu3 %v309_v44 }
 0x1cb   :  { %408 = vmatmul.msk.f32.vlgmr.msrb.gmra.mxu3 %vm313_vm15, %v310_v45 }
 0x24e   :  { %v334_v47 = vpop.f32.mrf.mxu3 }
 0x24f   :  { %v335_v48 = vadd.f32 %v334_v47, %v312_v46 }
 0x251   :  { %v409_v49 = vmul.f32 -1.442695, %v335_v48 }
 0x253   :  { %422 = vpow2.f32 %v409_v49 }
 0x259   :  { %v423_v50 = vpop.eup %422 }
 0x25a   :  { %v340_v51 = vadd.f32 1.0, %v423_v50 }
 0x25c   :  { %424 = vrcp.f32 %v340_v51  ;;  %v352_v55 = vand.u32 2147483648, %v340_v51  ;;  %v350_v57 = vand.u32 2147483647, %v340_v51  ;;  %vm346_vm1 = vweird.f32 %v340_v51 }
 0x25e   :  { %v353_v59 = vor.u32 1.1754944e-38, %v352_v55  ;;  %vm351_vm3 = vcmp.eq.f32.partialorder %v350_v57, 8.507059e+37 }
 0x262   :  { %v425_v52 = vpop.eup %424 }
 0x263   :  { %v342_v53 = vmul.f32 %v425_v52, %v340_v51  ;;  %vm347_vm0 = vweird.f32 %v425_v52 }
 0x264   :  { %vm348_vm2 = vmor %vm346_vm1, %vm347_vm0 }
 0x265   :  { %v343_v54 = vsub.f32 1.0, %v342_v53 }
 0x267   :  { %v344_v56 = vmul.f32 %v425_v52, %v343_v54 }
 0x269   :  { %v345_v58 = vadd.f32 %v425_v52, %v344_v56 }
 0x26b   :  { %v349_v60 = vsel %vm348_vm2, %v425_v52, %v345_v58 }
 0x26c   :  { %v354_v61 = vsel %vm351_vm3, %v353_v59, %v349_v60 }
 0x26d   :  { %356 = vst [vmem:[#allocation9] sm:$0x1] %v354_v61 }
 0x26e   :  { %367 = dma.vmem_to_hbm [thread:$0]  %s363_s9, 16, %s365_s10, [#allocation5]  }
 0x26f   :  { %526 = dma.done.wait [#allocation5], 16  }
 0x270   :  { %527 = vsyncadd [#allocation5], 4294967280 }
 0x271   :  { %372 = vsyncpa [#allocation4], 1 }
 0x272   :  { %373 = vsyncpa [#allocation7], 1 }
 0x273   :  { %374 = vsyncpa [#allocation5], 1 }

</bundles_post_ra>
